<compile_context>
chip_gen: v5e
topology: v5e:2x2
jax: 0.10.0
libtpu: 0.0.40
codegen_flags: <defaults>
</compile_context>

<pallas_src>
import jax
import jax.numpy as jnp
from jax.experimental import pallas as pl
from jax.experimental.pallas import tpu as pltpu

BN_EPS = 1e-5


# ----------------------------------------------------------------------------
# Pallas kernel: fused (upsample ∘ concat ∘ 1x1-conv ∘ BN ∘ ReLU)
# ----------------------------------------------------------------------------
def _decoder_fuse_kernel(de_ref, en_ref, wde_ref, wen_ref,
                         scale_ref, shift_ref, o_ref):
    # de_ref:     (tm, C_in)      bf16  low-res rows of `de`
    # en_ref:     (tm, 4*C_en)    bf16  four nearest-neighbour sub-grids packed on lanes
    # wde_ref:    (C_in, Npad)    bf16  W_de replicated 4x along output lanes
    # wen_ref:    (4*C_en, Npad)  bf16  block-diagonal W_en
    # scale/shift:(1, Npad)       f32   folded eval-mode BatchNorm affine
    zd = jnp.dot(de_ref[...], wde_ref[...], preferred_element_type=jnp.float32)
    ze = jnp.dot(en_ref[...], wen_ref[...], preferred_element_type=jnp.float32)
    y = (zd + ze) * scale_ref[...] + shift_ref[...]
    o_ref[...] = jnp.maximum(y, 0.0).astype(o_ref.dtype)


def _round_up(x, m):
    return (x + m - 1) // m * m


def _choose_tm(m):
    # 512-row tiles near HBM roofline for big M; 256 keeps >=2 parallel grid
    # steps (v7x has 2 TensorCores); tiny M -> single 8-aligned block.
    if m >= 2048:
        return 512
    if m >= 512:
        return 256
    return _round_up(m, 8)


# ----------------------------------------------------------------------------
# Wrapper: layout glue + weight packing + pallas_call
# ----------------------------------------------------------------------------
def decoder_block_forward(params, de_nchw, en_nchw):
    """Fused Decoder_Block forward.  `de` / `en` are NCHW (PyTorch layout)."""
    w = params["fuse_w"]                         # (C_out, C_in + C_out, 1, 1)
    gamma, beta, mean, var = params["bn"]        # eval-mode BatchNorm stats

    C_out, C_tot, _, _ = w.shape
    B, C_in, H, W = de_nchw.shape
    assert C_tot == C_in + C_out and C_out * 2 == C_in
    assert en_nchw.shape == (B, C_out, 2 * H, 2 * W)
    C_en = C_out
    M = B * H * W
    N = 4 * C_out                                # packed (i2, j2, c_out) lanes
    Npad = _round_up(N, 128)                     # lane-dense output block

    # ---- layout glue (plain JAX): NCHW -> row-major matmul operands --------
    de_rows = jnp.transpose(de_nchw, (0, 2, 3, 1)).reshape(M, C_in)
    en_nhwc = jnp.transpose(en_nchw, (0, 2, 3, 1))           # (B, 2H, 2W, C_en)
    en_rows = (en_nhwc.reshape(B, H, 2, W, 2, C_en)           # (b, h, i2, w, j2, c)
               .transpose(0, 1, 3, 2, 4, 5)                   # (b, h, w, i2, j2, c)
               .reshape(M, 4 * C_en))

    # ---- weights: split / replicate / block-diagonalize the 1x1 conv -------
    w2d = w[:, :, 0, 0]                                       # (C_out, C_in+C_en)
    w_de = jnp.transpose(w2d[:, :C_in])                       # (C_in, C_out)
    w_en = jnp.transpose(w2d[:, C_in:])                       # (C_en, C_out)
    w_de4 = jnp.concatenate([w_de] * 4, axis=1)               # (C_in, 4*C_out)
    w_en_bd = jnp.zeros((4 * C_en, N), w_en.dtype)
    for k in range(4):                                        # block diagonal
        w_en_bd = w_en_bd.at[k * C_en:(k + 1) * C_en,
                             k * C_out:(k + 1) * C_out].set(w_en)

    # folded eval-mode BatchNorm affine (conv has no bias)
    scale = gamma * jax.lax.rsqrt(var + BN_EPS)
    shift = beta - mean * scale
    scale4 = jnp.tile(scale, 4).reshape(1, N)
    shift4 = jnp.tile(shift, 4).reshape(1, N)

    # pad the output-lane dim to a multiple of 128 (zero weight columns)
    if Npad != N:
        w_de4 = jnp.pad(w_de4, ((0, 0), (0, Npad - N)))
        w_en_bd = jnp.pad(w_en_bd, ((0, 0), (0, Npad - N)))
        scale4 = jnp.pad(scale4, ((0, 0), (0, Npad - N)))
        shift4 = jnp.pad(shift4, ((0, 0), (0, Npad - N)))

    # row tiling with a zero-padded tail block
    tm = _choose_tm(M)
    Mpad = _round_up(M, tm)
    if Mpad != M:
        de_rows = jnp.pad(de_rows, ((0, Mpad - M), (0, 0)))
        en_rows = jnp.pad(en_rows, ((0, Mpad - M), (0, 0)))

    de_rows = de_rows.astype(jnp.bfloat16)
    en_rows = en_rows.astype(jnp.bfloat16)
    w_de4 = w_de4.astype(jnp.bfloat16)
    w_en_bd = w_en_bd.astype(jnp.bfloat16)
    scale4 = scale4.astype(jnp.float32)
    shift4 = shift4.astype(jnp.float32)

    K_en = 4 * C_en
    out = pl.pallas_call(
        _decoder_fuse_kernel,
        out_shape=jax.ShapeDtypeStruct((Mpad, Npad), jnp.float32),
        grid=(Mpad // tm,),
        in_specs=[
            pl.BlockSpec((tm, C_in), lambda i: (i, 0)),
            pl.BlockSpec((tm, K_en), lambda i: (i, 0)),
            pl.BlockSpec((C_in, Npad), lambda i: (0, 0)),
            pl.BlockSpec((K_en, Npad), lambda i: (0, 0)),
            pl.BlockSpec((1, Npad), lambda i: (0, 0)),
            pl.BlockSpec((1, Npad), lambda i: (0, 0)),
        ],
        out_specs=pl.BlockSpec((tm, Npad), lambda i: (i, 0)),
        compiler_params=pltpu.CompilerParams(
            dimension_semantics=("parallel",)),
    )(de_rows, en_rows, w_de4, w_en_bd, scale4, shift4)

    # ---- unpack (plain JAX): (M, 4*C_out) -> NCHW (B, C_out, 2H, 2W) -------
    out = out[:M, :N]
    out = (out.reshape(B, H, W, 2, 2, C_out)       # (b, h, w, i2, j2, c)
           .transpose(0, 1, 3, 2, 4, 5)            # (b, h, i2, w, j2, c)
           .reshape(B, 2 * H, 2 * W, C_out))
    return jnp.transpose(out, (0, 3, 1, 2))        # back to NCHW


# ----------------------------------------------------------------------------
# Parameters (deterministic synthetic init) and pure-JAX reference
# ----------------------------------------------------------------------------
def init_params(key, in_channel, out_channel):
    kw, kg, kb, km, kv = jax.random.split(key, 5)
    w = jax.random.normal(
        kw, (out_channel, in_channel + out_channel, 1, 1), jnp.float32) * 0.05
    gamma = 1.0 + 0.1 * jax.random.normal(kg, (out_channel,), jnp.float32)
    beta = 0.1 * jax.random.normal(kb, (out_channel,), jnp.float32)
    mean = 0.1 * jax.random.normal(km, (out_channel,), jnp.float32)
    var = jax.random.uniform(kv, (out_channel,), jnp.float32,
                             minval=0.5, maxval=1.5)
    return {"fuse_w": w, "bn": (gamma, beta, mean, var)}


def decoder_block_reference(params, de_nchw, en_nchw):
    """Straightforward JAX reference of the PyTorch module (eval-mode BN)."""
    w = params["fuse_w"][:, :, 0, 0]
    gamma, beta, mean, var = params["bn"]
    de_up = jnp.repeat(jnp.repeat(de_nchw, 2, axis=2), 2, axis=3)
    cat = jnp.concatenate([de_up, en_nchw], axis=1)
    # mirror the kernel's bf16 MXU inputs / f32 accumulation
    cat = cat.astype(jnp.bfloat16).astype(jnp.float32)
    wm = w.astype(jnp.bfloat16).astype(jnp.float32)
    y = jnp.einsum("oc,bchw->bohw", wm, cat)
    scale = gamma * jax.lax.rsqrt(var + BN_EPS)
    shift = beta - mean * scale
    y = y * scale[None, :, None, None] + shift[None, :, None, None]
    return jnp.maximum(y, 0.0)


# ----------------------------------------------------------------------------
if __name__ == "__main__":
    key = jax.random.PRNGKey(0)
    kp, kde, ken = jax.random.split(key, 3)

    # Small, module-consistent shapes: out_channel == in_channel // 2.
    B, C_in, H, W = 2, 64, 16, 16
    C_out = C_in // 2
    params = init_params(kp, C_in, C_out)
    de = jax.random.normal(kde, (B, C_in, H, W), jnp.float32)
    en = jax.random.normal(ken, (B, C_out, 2 * H, 2 * W), jnp.float32)

    fwd = jax.jit(decoder_block_forward)
    out = jax.block_until_ready(fwd(params, de, en))

    assert out.shape == (B, C_out, 2 * H, 2 * W), out.shape
    assert out.dtype == jnp.float32
    assert bool(jnp.all(jnp.isfinite(out)))

    ref = decoder_block_reference(params, de, en)
    max_err = float(jnp.max(jnp.abs(out - ref)))
    assert max_err < 2e-2, f"mismatch vs reference: {max_err}"

    print("KERNEL_OK")
</pallas_src>

<mosaic_0001>
module attributes {stable_mosaic.version = 11 : i64} {
  func.func @_decoder_fuse_kernel(%arg0: i32, %arg1: memref<256x64xbf16, #tpu.memory_space<vmem>>, %arg2: memref<256x128xbf16, #tpu.memory_space<vmem>>, %arg3: memref<64x128xbf16, #tpu.memory_space<vmem>>, %arg4: memref<128x128xbf16, #tpu.memory_space<vmem>>, %arg5: memref<1x128xf32, #tpu.memory_space<vmem>>, %arg6: memref<1x128xf32, #tpu.memory_space<vmem>>, %arg7: memref<256x128xf32, #tpu.memory_space<vmem>>) attributes {dimension_semantics = [#tpu.dimension_semantics<parallel>], iteration_bounds = array<i64: 2>, scalar_prefetch = 0 : i64, scratch_operands = 0 : i64, tpu.core_type = #tpu.core_type<tc>, window_params = [{transform_indices = @transform_0, window_bounds = array<i64: 256, 64>}, {transform_indices = @transform_1, window_bounds = array<i64: 256, 128>}, {pipeline_mode = #tpu.pipeline_mode<synchronous>, transform_indices = @transform_2, window_bounds = array<i64: 64, 128>}, {pipeline_mode = #tpu.pipeline_mode<synchronous>, transform_indices = @transform_3, window_bounds = array<i64: 128, 128>}, {pipeline_mode = #tpu.pipeline_mode<synchronous>, transform_indices = @transform_4, window_bounds = array<i64: 1, 128>}, {pipeline_mode = #tpu.pipeline_mode<synchronous>, transform_indices = @transform_5, window_bounds = array<i64: 1, 128>}, {transform_indices = @transform_6, window_bounds = array<i64: 256, 128>}]} {
    %c0 = arith.constant 0 : index
    %c0_0 = arith.constant 0 : index
    %0 = vector.load %arg1[%c0, %c0_0] : memref<256x64xbf16, #tpu.memory_space<vmem>>, vector<256x64xbf16>
    %c0_1 = arith.constant 0 : index
    %c0_2 = arith.constant 0 : index
    %1 = vector.load %arg3[%c0_1, %c0_2] : memref<64x128xbf16, #tpu.memory_space<vmem>>, vector<64x128xbf16>
    %cst = arith.constant dense<0.000000e+00> : vector<256x128xf32>
    %2 = tpu.matmul %0, %1, %cst {dimension_numbers = #tpu.dot_dimension_numbers<[1], [0], [0], [1], [0, 0, 1, 1], [], []>} : vector<256x64xbf16>, vector<64x128xbf16>, vector<256x128xf32> -> vector<256x128xf32>
    %c0_3 = arith.constant 0 : index
    %c0_4 = arith.constant 0 : index
    %3 = vector.load %arg2[%c0_3, %c0_4] : memref<256x128xbf16, #tpu.memory_space<vmem>>, vector<256x128xbf16>
    %c0_5 = arith.constant 0 : index
    %c0_6 = arith.constant 0 : index
    %4 = vector.load %arg4[%c0_5, %c0_6] : memref<128x128xbf16, #tpu.memory_space<vmem>>, vector<128x128xbf16>
    %cst_7 = arith.constant dense<0.000000e+00> : vector<256x128xf32>
    %5 = tpu.matmul %3, %4, %cst_7 {dimension_numbers = #tpu.dot_dimension_numbers<[1], [0], [0], [1], [0, 0, 1, 1], [], []>} : vector<256x128xbf16>, vector<128x128xbf16>, vector<256x128xf32> -> vector<256x128xf32>
    %6 = arith.addf %2, %5 : vector<256x128xf32>
    %c0_8 = arith.constant 0 : index
    %c0_9 = arith.constant 0 : index
    %7 = vector.load %arg5[%c0_8, %c0_9] : memref<1x128xf32, #tpu.memory_space<vmem>>, vector<1x128xf32>
    %8 = vector.broadcast %7 : vector<1x128xf32> to vector<256x128xf32>
    %9 = arith.mulf %6, %8 : vector<256x128xf32>
    %c0_10 = arith.constant 0 : index
    %c0_11 = arith.constant 0 : index
    %10 = vector.load %arg6[%c0_10, %c0_11] : memref<1x128xf32, #tpu.memory_space<vmem>>, vector<1x128xf32>
    %11 = vector.broadcast %10 : vector<1x128xf32> to vector<256x128xf32>
    %12 = arith.addf %9, %11 : vector<256x128xf32>
    %cst_12 = arith.constant 0.000000e+00 : f32
    %13 = vector.broadcast %cst_12 : f32 to vector<256x128xf32>
    %14 = arith.maximumf %12, %13 : vector<256x128xf32>
    %c0_13 = arith.constant 0 : index
    %c0_14 = arith.constant 0 : index
    %15 = vector.load %arg7[%c0_13, %c0_14] : memref<256x128xf32, #tpu.memory_space<vmem>>, vector<256x128xf32>
    tpu.vector_store %arg7[%c0_13, %c0_14], %14 {strides = array<i32>} : memref<256x128xf32, #tpu.memory_space<vmem>>, vector<256x128xf32>,
    return
  }
  func.func @transform_0(%arg0: i32) -> (i32, i32) {
    %c0_i32 = arith.constant 0 : i32
    %c0_i32_0 = arith.constant 0 : i32
    return %arg0, %c0_i32 : i32, i32
  }
  func.func @transform_1(%arg0: i32) -> (i32, i32) {
    %c0_i32 = arith.constant 0 : i32
    %c0_i32_0 = arith.constant 0 : i32
    return %arg0, %c0_i32 : i32, i32
  }
  func.func @transform_2(%arg0: i32) -> (i32, i32) {
    %c0_i32 = arith.constant 0 : i32
    %c0_i32_0 = arith.constant 0 : i32
    %c0_i32_1 = arith.constant 0 : i32
    return %c0_i32, %c0_i32_0 : i32, i32
  }
  func.func @transform_3(%arg0: i32) -> (i32, i32) {
    %c0_i32 = arith.constant 0 : i32
    %c0_i32_0 = arith.constant 0 : i32
    %c0_i32_1 = arith.constant 0 : i32
    return %c0_i32, %c0_i32_0 : i32, i32
  }
  func.func @transform_4(%arg0: i32) -> (i32, i32) {
    %c0_i32 = arith.constant 0 : i32
    %c0_i32_0 = arith.constant 0 : i32
    %c0_i32_1 = arith.constant 0 : i32
    return %c0_i32, %c0_i32_0 : i32, i32
  }
  func.func @transform_5(%arg0: i32) -> (i32, i32) {
    %c0_i32 = arith.constant 0 : i32
    %c0_i32_0 = arith.constant 0 : i32
    %c0_i32_1 = arith.constant 0 : i32
    return %c0_i32, %c0_i32_0 : i32, i32
  }
  func.func @transform_6(%arg0: i32) -> (i32, i32) {
    %c0_i32 = arith.constant 0 : i32
    %c0_i32_0 = arith.constant 0 : i32
    return %arg0, %c0_i32 : i32, i32
  }
}

</mosaic_0001>

<bundles_post_ra>
// kernel: tile.19
= control target key start
LH: loop header
LB: loop body
LE: loop exit
PB: predicated region body
PF: predicated region fallthrough
CT: control target
= control target key end

     0   :  { %s37_s8 = smov 32   ;;  %s38_s9 = smov 64   ;;  %vm7_vm0 = vcmask 261120   ;;  %vm13_vm1 = vcmask 1048320   ;;  %vm19_vm2 = vcmask 785920   ;;  %vm25_vm3 = vcmask 523520   ;;  %s55_s0 = inlined_call_operand.vmem [shape: f32[4,32], index: 0, kind: input, shape index: {}]   ;;  %s56_s1 = inlined_call_operand.vmem [shape: f32[1,128], index: 1, kind: output, shape index: {}]  }
   0x1   :  { %v4_v0 = vld [vmem:[%s55_s0] sm:$0xf]  ;;  %s36_s0 = smov 96  }
   0x2   :  { %5 = vst [vmem:[#allocation1] sm:$0xf] %v4_v0 }
   0x9   :  { %v10_v1 = vld [vmem:[#allocation1 + $0x3] sm:$0x1]   ;;  %v22_v2 = vld [vmem:[#allocation1 + $0x1] sm:$0x1]   ;;  %v16_v3 = vld [vmem:[#allocation1 + $0x2] sm:$0x1]  }
   0xa   :  { %11 = vrot.lane.b32.xlu0 %v10_v1, %s36_s0  ;;  %23 = vrot.lane.b32.xlu1 %v22_v2, %s37_s8  ;;  %v6_v4 = vld [vmem:[#allocation1] sm:$0x1]  }
   0xb   :  { %8 = vst.msk [vmem:[#allocation0] sm:$0x1] %vm7_vm0, %v6_v4  }
  0x12   :  { %17 = vrot.lane.b32.xlu0 %v16_v3, %s38_s9 }
  0x7c   :  { %v12_v5 = vpop.permute.xlu0 %11   ;;  %v24_v6 = vpop.permute.xlu1 %23  }
  0x7d   :  { %14 = vst.msk [vmem:[#allocation0] sm:$0x1] %vm13_vm1, %v12_v5  }
  0x84   :  { %v18_v7 = vpop.permute.xlu0 %17  }
  0x85   :  { %20 = vst.msk [vmem:[#allocation0] sm:$0x1] %vm19_vm2, %v18_v7  }
  0x86   :  { %26 = vst.msk [vmem:[#allocation0] sm:$0x1] %vm25_vm3, %v24_v6  }
  0x8d   :  { %v29_v8 = vld [vmem:[#allocation0] sm:$0x1] }
  0x8e   :  { %32 = vst [vmem:[%s56_s1] sm:$0x1] %v29_v8 }

// kernel: tile.18
= control target key start
LH: loop header
LB: loop body
LE: loop exit
PB: predicated region body
PF: predicated region fallthrough
CT: control target
= control target key end

     0   :  { %s22_s0 = inlined_call_operand.vmem [shape: f32[32], index: 0, kind: input, shape index: {}]   ;;  %s23_s1 = inlined_call_operand.vmem [shape: f32[4,32], index: 1, kind: output, shape index: {}]  }
   0x1   :  { %v4_v0 = vld [vmem:[%s22_s0] ss:$0 sm:$0xff] }
   0x2   :  { %5 = vst [vmem:[%s23_s1] sm:$0xf] %v4_v0 }

// kernel: decoder_block_forward.1
= control target key start
LH: loop header
LB: loop body
LE: loop exit
PB: predicated region body
PF: predicated region fallthrough
CT: control target
= control target key end

     0   :  { %s1359_s21 = smov 0   ;;  %s1585_s0 = inlined_call_operand.vmem [shape: bf16[512,64], index: 0, kind: input, shape index: {}]   ;;  %s1586_s1 = inlined_call_operand.vmem [shape: bf16[512,128], index: 1, kind: input, shape index: {}]   ;;  %s1587_s2 = inlined_call_operand.vmem [shape: bf16[64,128], index: 2, kind: input, shape index: {}]   ;;  %s1588_s3 = inlined_call_operand.vmem [shape: bf16[128,128], index: 3, kind: input, shape index: {}]   ;;  %s1589_s4 = inlined_call_operand.vmem [shape: f32[1,128], index: 4, kind: input, shape index: {}]   ;;  %s1590_s5 = inlined_call_operand.vmem [shape: f32[1,128], index: 5, kind: input, shape index: {}]   ;;  %s1591_s6 = inlined_call_operand.vmem [shape: f32[512,128], index: 6, kind: output, shape index: {}]  }
   0x1 LB: > { %s1045_s22 = sadd.s32 4294967295, %s1322_s21   ;;  %p1049_p0 = scmp.ge.s32.totalorder %s1322_s21, 1  ;;  %s1322_s21 = sphi %s1359_s21, %s16_s21  }
   0x2   : > { %p224_p1 = scmp.lt.s32.totalorder %s1322_s21, 3 }
   0x4   : > { %p225_p2 = pnand %p1049_p0, %p224_p1 }
   0x5   : > { %s1050_s27 = sshll.u32 (!%p225_p2), %s1045_s22, 5 }
   0x6   : > { %228 = sbr.rel (%p225_p2) target bundleno = 305 (0x131), region = 44  ;;  %p260_p3 = scmp.lt.s32.totalorder (!%p225_p2), %s1050_s27, 63 }
   0xb   : > { %v1293_v0 = vld [vmem:[%s1588_s3 + $0x38] sm:$0xff]  ;;  %v1292_v2 = vld [vmem:[%s1588_s3 + $0x30] sm:$0xff]  ;;  %s1593_s27 = smov (!%p260_p3, %s1050_s27), 63  ;;  %v1291_v4 = vld [vmem:[%s1588_s3 + $0x28] sm:$0xff]  ;;  %vm703_vm0 = vcmask 523264  }
   0xc   : > { %v1269_v1 = vld [vmem:[%s1587_s2 + $0x18] sm:$0xff]  ;;  %510 = vmatpush.bf16.msra.mxu0 %v1293_v0  ;;  %1294 = vmatpush.bf16.msra.mxu2 %v1293_v0  ;;  %v1268_v3 = vld [vmem:[%s1587_s2 + $0x10] sm:$0xff]  ;;  %v1267_v5 = vld [vmem:[%s1587_s2 + $0x8] sm:$0xff]  ;;  %s1051_s12 = sshll.u32 %s1593_s27, 2  ;;  %s1055_s13 = sshll.u32 %s1593_s27, 3 }
   0xd   : > { %756 = vmatpush.bf16.msra.mxu1 %v1269_v1  ;;  %1302 = vmatpush.bf16.msra.mxu3 %v1269_v1  ;;  %v1290_v6 = vld [vmem:[%s1588_s3 + $0x20] sm:$0xff]  ;;  %s1397_s19 = scalar_lea.vmem %s1585_s0, %s1051_s12  ;;  %v1289_v9 = vld [vmem:[%s1588_s3 + $0x18] sm:$0xff]  ;;  %v1288_v11 = vld [vmem:[%s1588_s3 + $0x10] sm:$0xff]  ;;  %s1418_s8 = scalar_lea.vmem %s1586_s1, %s1051_s12 }
   0xe   : > { %v1266_v7 = vld [vmem:[%s1587_s2] sm:$0xff]  ;;  %v1259_v10 = vld [vmem:[%s1397_s19 + $0x48] sm:$0xff]  ;;  %v1260_v17 = vld [vmem:[%s1397_s19 + $0x50] sm:$0xff]  ;;  %s1480_s16 = scalar_lea.vmem %s1591_s6, %s1055_s13 }
   0xf   : > { %v1250_v8 = vld [vmem:[%s1397_s19] sm:$0xff]  ;;  %v1287_v12 = vld [vmem:[%s1588_s3 + $0x8] sm:$0xff]  ;;  %v1252_v20 = vld [vmem:[%s1397_s19 + $0x10] sm:$0xff] }
  0x10   : > { %511 = vmatpush.bf16.msra.mxu0 %v1292_v2  ;;  %1295 = vmatpush.bf16.msra.mxu2 %v1292_v2  ;;  %v1286_v13 = vld [vmem:[%s1588_s3] sm:$0xff]  ;;  %v1251_v16 = vld [vmem:[%s1397_s19 + $0x8] sm:$0xff]  ;;  %v1261_v21 = vld [vmem:[%s1397_s19 + $0x58] sm:$0xff] }
  0x11   : > { %757 = vmatpush.bf16.msra.mxu1 %v1268_v3  ;;  %1303 = vmatpush.bf16.msra.mxu3 %v1268_v3  ;;  %v1270_v14 = vld [vmem:[%s1418_s8] sm:$0xff]  ;;  %v1271_v18 = vld [vmem:[%s1418_s8 + $0x8] sm:$0xff]  ;;  %v1272_v22 = vld [vmem:[%s1418_s8 + $0x10] sm:$0xff] }
  0x12   : > { %v1278_v15 = vld [vmem:[%s1418_s8 + $0x40] sm:$0xff]  ;;  %v1279_v19 = vld [vmem:[%s1418_s8 + $0x48] sm:$0xff]  ;;  %v1280_v23 = vld [vmem:[%s1418_s8 + $0x50] sm:$0xff] }
  0x13   : > { %v1253_v24 = vld [vmem:[%s1397_s19 + $0x18] sm:$0xff]  ;;  %v1262_v25 = vld [vmem:[%s1397_s19 + $0x60] sm:$0xff]  ;;  %v1263_v29 = vld [vmem:[%s1397_s19 + $0x68] sm:$0xff] }
  0x14   : > { %512 = vmatpush.bf16.msra.mxu0 %v1291_v4  ;;  %1296 = vmatpush.bf16.msra.mxu2 %v1291_v4  ;;  %v1273_v26 = vld [vmem:[%s1418_s8 + $0x18] sm:$0xff]  ;;  %v1254_v28 = vld [vmem:[%s1397_s19 + $0x20] sm:$0xff]  ;;  %v1255_v32 = vld [vmem:[%s1397_s19 + $0x28] sm:$0xff] }
  0x15   : > { %758 = vmatpush.bf16.msra.mxu1 %v1267_v5  ;;  %1304 = vmatpush.bf16.msra.mxu3 %v1267_v5  ;;  %v1281_v27 = vld [vmem:[%s1418_s8 + $0x58] sm:$0xff]  ;;  %v1274_v30 = vld [vmem:[%s1418_s8 + $0x20] sm:$0xff]  ;;  %v1264_v33 = vld [vmem:[%s1397_s19 + $0x70] sm:$0xff] }
  0x16   : > { %v1282_v31 = vld [vmem:[%s1418_s8 + $0x60] sm:$0xff]  ;;  %v1275_v34 = vld [vmem:[%s1418_s8 + $0x28] sm:$0xff]  ;;  %v1256_v36 = vld [vmem:[%s1397_s19 + $0x30] sm:$0xff] }
  0x17   : > { %v1283_v35 = vld [vmem:[%s1418_s8 + $0x68] sm:$0xff]  ;;  %v1265_v37 = vld [vmem:[%s1397_s19 + $0x78] sm:$0xff]  ;;  %v1276_v38 = vld [vmem:[%s1418_s8 + $0x30] sm:$0xff] }
  0x18   : > { %513 = vmatpush.bf16.msra.mxu0 %v1290_v6  ;;  %1297 = vmatpush.bf16.msra.mxu2 %v1290_v6  ;;  %v1284_v39 = vld [vmem:[%s1418_s8 + $0x70] sm:$0xff]  ;;  %v1257_v40 = vld [vmem:[%s1397_s19 + $0x38] sm:$0xff]  ;;  %v1258_v43 = vld [vmem:[%s1397_s19 + $0x40] sm:$0xff] }
  0x19   : > { %759 = vmatpush.bf16.msra.mxu1 %v1266_v7  ;;  %1305 = vmatpush.bf16.msra.mxu3 %v1266_v7  ;;  %v1277_v41 = vld [vmem:[%s1418_s8 + $0x38] sm:$0xff]  ;;  %v1467_v47 = vld [vmem:[%s1589_s4] ss:$0 sm:$0xff] }
  0x1a   : > { %v1285_v42 = vld [vmem:[%s1418_s8 + $0x78] sm:$0xff]  ;;  %v1472_v50 = vld [vmem:[%s1590_s5] ss:$0 sm:$0xff] }
  0x1c   : > { %1232 = vmatmul.msk.bf16.vlgmr.msra.gmra.mxu1 %vm703_vm0, %v1250_v8  ;;  %514 = vmatpush.bf16.msra.mxu0 %v1289_v9 }
  0x1d   : > { %1298 = vmatpush.bf16.msra.mxu2 %v1289_v9  ;;  %1241 = vmatmul.msk.bf16.vlgmr.msra.gmra.mxu3 %vm703_vm0, %v1259_v10 }
  0x20   : > { %515 = vmatpush.bf16.msra.mxu0 %v1288_v11 }
  0x21   : > { %1299 = vmatpush.bf16.msra.mxu2 %v1288_v11 }
  0x24   : > { %516 = vmatpush.bf16.msra.mxu0 %v1287_v12 }
  0x25   : > { %1300 = vmatpush.bf16.msra.mxu2 %v1287_v12 }
  0x28   : > { %517 = vmatpush.bf16.msra.mxu0 %v1286_v13 }
  0x29   : > { %1301 = vmatpush.bf16.msra.mxu2 %v1286_v13 }
  0x2b   : > { %518 = vmatmul.bf16.vlgmr.msra.gmra.mxu0 %v1270_v14 }
  0x2c   : > { %558 = vmatmul.bf16.vlgmr.msra.gmra.mxu2 %v1278_v15  ;;  %1233 = vmatmul.msk.bf16.gmra.mxu1 %vm703_vm0, %v1251_v16 }
  0x2d   : > { %1242 = vmatmul.msk.bf16.gmra.mxu3 %vm703_vm0, %v1260_v17 }
  0x3b   : > { %523 = vmatmul.bf16.gmra.mxu0 %v1271_v18 }
  0x3c   : > { %563 = vmatmul.bf16.gmra.mxu2 %v1279_v19  ;;  %1234 = vmatmul.msk.bf16.gmra.mxu1 %vm703_vm0, %v1252_v20 }
  0x3d   : > { %1243 = vmatmul.msk.bf16.gmra.mxu3 %vm703_vm0, %v1261_v21 }
  0x4b   : > { %528 = vmatmul.bf16.gmra.mxu0 %v1272_v22 }
  0x4c   : > { %568 = vmatmul.bf16.gmra.mxu2 %v1280_v23  ;;  %1235 = vmatmul.msk.bf16.gmra.mxu1 %vm703_vm0, %v1253_v24 }
  0x4d   : > { %1244 = vmatmul.msk.bf16.gmra.mxu3 %vm703_vm0, %v1262_v25 }
  0x5b   : > { %533 = vmatmul.bf16.gmra.mxu0 %v1273_v26 }
  0x5c   : > { %573 = vmatmul.bf16.gmra.mxu2 %v1281_v27  ;;  %1236 = vmatmul.msk.bf16.gmra.mxu1 %vm703_vm0, %v1254_v28 }
  0x5d   : > { %1245 = vmatmul.msk.bf16.gmra.mxu3 %vm703_vm0, %v1263_v29 }
  0x6b   : > { %538 = vmatmul.bf16.gmra.mxu0 %v1274_v30 }
  0x6c   : > { %578 = vmatmul.bf16.gmra.mxu2 %v1282_v31  ;;  %1237 = vmatmul.msk.bf16.gmra.mxu1 %vm703_vm0, %v1255_v32 }
  0x6d   : > { %1246 = vmatmul.msk.bf16.gmra.mxu3 %vm703_vm0, %v1264_v33 }
  0x7b   : > { %543 = vmatmul.bf16.gmra.mxu0 %v1275_v34 }
  0x7c   : > { %583 = vmatmul.bf16.gmra.mxu2 %v1283_v35  ;;  %1238 = vmatmul.msk.bf16.gmra.mxu1 %vm703_vm0, %v1256_v36 }
  0x7d   : > { %1247 = vmatmul.msk.bf16.gmra.mxu3 %vm703_vm0, %v1265_v37 }
  0x8b   : > { %548 = vmatmul.bf16.gmra.mxu0 %v1276_v38 }
  0x8c   : > { %588 = vmatmul.bf16.gmra.mxu2 %v1284_v39  ;;  %1239 = vmatmul.msk.bf16.gmra.mxu1 %vm703_vm0, %v1257_v40 }
  0x99   : > { %v761_v44 = vpop.f32.mrf.mxu1 }
  0x9b   : > { %553 = vmatmul.bf16.gmra.mxu0 %v1277_v41 }
  0x9c   : > { %593 = vmatmul.bf16.gmra.mxu2 %v1285_v42  ;;  %1240 = vmatmul.msk.bf16.gmra.mxu1 %vm703_vm0, %v1258_v43 }
  0xa0   : > { %v806_v46 = vpop.f32.mrf.mxu3 }
  0xa1   : > { %v763_v45 = vpop.f32.mrf.mxu1 }
  0xa8   : > { %v519_v48 = vpop.f32.mrf.mxu0  ;;  %v808_v56 = vpop.f32.mrf.mxu3 }
  0xa9   : > { %v762_v49 = vadd.f32 %v761_v44, %v519_v48  ;;  %v766_v51 = vpop.f32.mrf.mxu1 }
  0xab   : > { %v845_v52 = vmul.f32 %v1467_v47, %v762_v49 }
  0xad   : > { %v881_v53 = vadd.f32 %v1472_v50, %v845_v52 }
  0xaf   : > { %v913_v54 = vmax.f32 %v881_v53, 0.0  ;;  %v1482_v55 = vpop.f32.mrf.mxu2 }
  0xb0   : > { %v521_v57 = vpop.f32.mrf.mxu0  ;;  %v811_v3 = vpop.f32.mrf.mxu3 }
  0xb1   : > { %945 = vst [vmem:[%s1480_s16] sm:$0xff] %v913_v54  ;;  %v764_v58 = vadd.f32 %v763_v45, %v521_v57  ;;  %v768_v59 = vpop.f32.mrf.mxu1 }
  0xb3   : > { %v846_v60 = vmul.f32 %v1467_v47, %v764_v58 }
  0xb5   : > { %v882_v61 = vadd.f32 %v1472_v50, %v846_v60 }
  0xb7   : > { %v914_v62 = vmax.f32 %v882_v61, 0.0  ;;  %v1487_v63 = vpop.f32.mrf.mxu2 }
  0xb8   : > { %v524_v0 = vpop.f32.mrf.mxu0  ;;  %v813_v14 = vpop.f32.mrf.mxu3 }
  0xb9   : > { %946 = vst [vmem:[%s1480_s16 + $0x8] sm:$0xff] %v914_v62  ;;  %v767_v1 = vadd.f32 %v766_v51, %v524_v0  ;;  %v771_v2 = vpop.f32.mrf.mxu1 }
  0xbb   : > { %v847_v4 = vmul.f32 %v1467_v47, %v767_v1 }
  0xbd   : > { %v883_v5 = vadd.f32 %v1472_v50, %v847_v4 }
  0xbf   : > { %v915_v6 = vmax.f32 %v883_v5, 0.0  ;;  %v564_v7 = vpop.f32.mrf.mxu2 }
  0xc0   : > { %v807_v8 = vadd.f32 %v806_v46, %v564_v7  ;;  %v526_v9 = vpop.f32.mrf.mxu0  ;;  %v816_v28 = vpop.f32.mrf.mxu3 }
  0xc1   : > { %947 = vst [vmem:[%s1480_s16 + $0x10] sm:$0xff] %v915_v6  ;;  %v769_v10 = vadd.f32 %v768_v59, %v526_v9  ;;  %v773_v11 = vpop.f32.mrf.mxu1 }
  0xc2   : > { %v863_v12 = vmul.f32 %v1467_v47, %v807_v8 }
  0xc3   : > { %v848_v13 = vmul.f32 %v1467_v47, %v769_v10 }
  0xc4   : > { %v899_v15 = vadd.f32 %v1472_v50, %v863_v12 }
  0xc5   : > { %v884_v16 = vadd.f32 %v1472_v50, %v848_v13 }
  0xc6   : > { %v931_v17 = vmax.f32 %v899_v15, 0.0 }
  0xc7   : > { %v916_v18 = vmax.f32 %v884_v16, 0.0  ;;  %v566_v19 = vpop.f32.mrf.mxu2 }
  0xc8   : > { %963 = vst [vmem:[%s1480_s16 + $0x90] sm:$0xff] %v931_v17  ;;  %v809_v20 = vadd.f32 %v808_v56, %v566_v19  ;;  %v529_v21 = vpop.f32.mrf.mxu0  ;;  %v818_v43 = vpop.f32.mrf.mxu3 }
  0xc9   : > { %948 = vst [vmem:[%s1480_s16 + $0x18] sm:$0xff] %v916_v18  ;;  %v772_v22 = vadd.f32 %v771_v2, %v529_v21  ;;  %v776_v23 = vpop.f32.mrf.mxu1 }
  0xca   : > { %v864_v24 = vmul.f32 %v1467_v47, %v809_v20 }
  0xcb   : > { %v849_v25 = vmul.f32 %v1467_v47, %v772_v22 }
  0xcc   : > { %v900_v26 = vadd.f32 %v1472_v50, %v864_v24 }
  0xcd   : > { %v885_v27 = vadd.f32 %v1472_v50, %v849_v25 }
  0xce   : > { %v932_v29 = vmax.f32 %v900_v26, 0.0 }
  0xcf   : > { %v917_v30 = vmax.f32 %v885_v27, 0.0  ;;  %v569_v31 = vpop.f32.mrf.mxu2 }
  0xd0   : > { %964 = vst [vmem:[%s1480_s16 + $0x98] sm:$0xff] %v932_v29  ;;  %v812_v32 = vadd.f32 %v811_v3, %v569_v31  ;;  %v531_v33 = vpop.f32.mrf.mxu0  ;;  %v821_v62 = vpop.f32.mrf.mxu3 }
  0xd1   : > { %949 = vst [vmem:[%s1480_s16 + $0x20] sm:$0xff] %v917_v30  ;;  %v774_v34 = vadd.f32 %v773_v11, %v531_v33  ;;  %v778_v35 = vpop.f32.mrf.mxu1 }
  0xd2   : > { %v865_v36 = vmul.f32 %v1467_v47, %v812_v32 }
  0xd3   : > { %v850_v37 = vmul.f32 %v1467_v47, %v774_v34 }
  0xd4   : > { %v901_v38 = vadd.f32 %v1472_v50, %v865_v36 }
  0xd5   : > { %v886_v39 = vadd.f32 %v1472_v50, %v850_v37 }
  0xd6   : > { %v933_v40 = vmax.f32 %v901_v38, 0.0 }
  0xd7   : > { %v918_v41 = vmax.f32 %v886_v39, 0.0  ;;  %v571_v42 = vpop.f32.mrf.mxu2 }
  0xd8   : > { %965 = vst [vmem:[%s1480_s16 + $0xa0] sm:$0xff] %v933_v40  ;;  %v814_v44 = vadd.f32 %v813_v14, %v571_v42  ;;  %v534_v45 = vpop.f32.mrf.mxu0  ;;  %v823_v13 = vpop.f32.mrf.mxu3 }
  0xd9   : > { %950 = vst [vmem:[%s1480_s16 + $0x28] sm:$0xff] %v918_v41  ;;  %v777_v46 = vadd.f32 %v776_v23, %v534_v45  ;;  %v781_v48 = vpop.f32.mrf.mxu1 }
  0xda   : > { %v866_v49 = vmul.f32 %v1467_v47, %v814_v44 }
  0xdb   : > { %v851_v51 = vmul.f32 %v1467_v47, %v777_v46 }
  0xdc   : > { %v902_v52 = vadd.f32 %v1472_v50, %v866_v49 }
  0xdd   : > { %v887_v53 = vadd.f32 %v1472_v50, %v851_v51 }
  0xde   : > { %v934_v54 = vmax.f32 %v902_v52, 0.0 }
  0xdf   : > { %v919_v56 = vmax.f32 %v887_v53, 0.0  ;;  %v574_v57 = vpop.f32.mrf.mxu2 }
  0xe0   : > { %966 = vst [vmem:[%s1480_s16 + $0xa8] sm:$0xff] %v934_v54  ;;  %v817_v58 = vadd.f32 %v816_v28, %v574_v57  ;;  %v536_v59 = vpop.f32.mrf.mxu0  ;;  %v826_v27 = vpop.f32.mrf.mxu3 }
  0xe1   : > { %951 = vst [vmem:[%s1480_s16 + $0x30] sm:$0xff] %v919_v56  ;;  %v779_v60 = vadd.f32 %v778_v35, %v536_v59  ;;  %v783_v61 = vpop.f32.mrf.mxu1 }
  0xe2   : > { %v867_v0 = vmul.f32 %v1467_v47, %v817_v58 }
  0xe3   : > { %v852_v1 = vmul.f32 %v1467_v47, %v779_v60 }
  0xe4   : > { %v903_v2 = vadd.f32 %v1472_v50, %v867_v0 }
  0xe5   : > { %v888_v3 = vadd.f32 %v1472_v50, %v852_v1 }
  0xe6   : > { %v935_v4 = vmax.f32 %v903_v2, 0.0 }
  0xe7   : > { %v920_v5 = vmax.f32 %v888_v3, 0.0  ;;  %v576_v6 = vpop.f32.mrf.mxu2 }
  0xe8   : > { %967 = vst [vmem:[%s1480_s16 + $0xb0] sm:$0xff] %v935_v4  ;;  %v819_v7 = vadd.f32 %v818_v43, %v576_v6  ;;  %v539_v8 = vpop.f32.mrf.mxu0  ;;  %v828_v42 = vpop.f32.mrf.mxu3 }
  0xe9   : > { %952 = vst [vmem:[%s1480_s16 + $0x38] sm:$0xff] %v920_v5  ;;  %v782_v9 = vadd.f32 %v781_v48, %v539_v8  ;;  %v786_v10 = vpop.f32.mrf.mxu1 }
  0xea   : > { %v868_v11 = vmul.f32 %v1467_v47, %v819_v7 }
  0xeb   : > { %v853_v12 = vmul.f32 %v1467_v47, %v782_v9 }
  0xec   : > { %v904_v14 = vadd.f32 %v1472_v50, %v868_v11 }
  0xed   : > { %v889_v15 = vadd.f32 %v1472_v50, %v853_v12 }
  0xee   : > { %v936_v16 = vmax.f32 %v904_v14, 0.0 }
  0xef   : > { %v921_v17 = vmax.f32 %v889_v15, 0.0  ;;  %v579_v18 = vpop.f32.mrf.mxu2 }
  0xf0   : > { %968 = vst [vmem:[%s1480_s16 + $0xb8] sm:$0xff] %v936_v16  ;;  %v822_v19 = vadd.f32 %v821_v62, %v579_v18  ;;  %v541_v20 = vpop.f32.mrf.mxu0  ;;  %v831_v59 = vpop.f32.mrf.mxu3 }
  0xf1   : > { %953 = vst [vmem:[%s1480_s16 + $0x40] sm:$0xff] %v921_v17  ;;  %v784_v21 = vadd.f32 %v783_v61, %v541_v20  ;;  %v788_v22 = vpop.f32.mrf.mxu1 }
  0xf2   : > { %v869_v23 = vmul.f32 %v1467_v47, %v822_v19 }
  0xf3   : > { %v854_v24 = vmul.f32 %v1467_v47, %v784_v21 }
  0xf4   : > { %v905_v25 = vadd.f32 %v1472_v50, %v869_v23 }
  0xf5   : > { %v890_v26 = vadd.f32 %v1472_v50, %v854_v24 }
  0xf6   : > { %v937_v28 = vmax.f32 %v905_v25, 0.0 }
  0xf7   : > { %v922_v29 = vmax.f32 %v890_v26, 0.0  ;;  %v581_v30 = vpop.f32.mrf.mxu2 }
  0xf8   : > { %969 = vst [vmem:[%s1480_s16 + $0xc0] sm:$0xff] %v937_v28  ;;  %v824_v31 = vadd.f32 %v823_v13, %v581_v30  ;;  %v544_v32 = vpop.f32.mrf.mxu0  ;;  %v833_v11 = vpop.f32.mrf.mxu3 }
  0xf9   : > { %954 = vst [vmem:[%s1480_s16 + $0x48] sm:$0xff] %v922_v29  ;;  %v787_v33 = vadd.f32 %v786_v10, %v544_v32  ;;  %v791_v34 = vpop.f32.mrf.mxu1 }
  0xfa   : > { %v870_v35 = vmul.f32 %v1467_v47, %v824_v31 }
  0xfb   : > { %v855_v36 = vmul.f32 %v1467_v47, %v787_v33 }
  0xfc   : > { %v906_v37 = vadd.f32 %v1472_v50, %v870_v35 }
  0xfd   : > { %v891_v38 = vadd.f32 %v1472_v50, %v855_v36 }
  0xfe   : > { %v938_v39 = vmax.f32 %v906_v37, 0.0 }
  0xff   : > { %v923_v40 = vmax.f32 %v891_v38, 0.0  ;;  %v584_v41 = vpop.f32.mrf.mxu2 }
 0x100   : > { %970 = vst [vmem:[%s1480_s16 + $0xc8] sm:$0xff] %v938_v39  ;;  %v827_v43 = vadd.f32 %v826_v27, %v584_v41  ;;  %v546_v44 = vpop.f32.mrf.mxu0  ;;  %v836_v27 = vpop.f32.mrf.mxu3 }
 0x101   : > { %955 = vst [vmem:[%s1480_s16 + $0x50] sm:$0xff] %v923_v40  ;;  %v789_v45 = vadd.f32 %v788_v22, %v546_v44  ;;  %v793_v46 = vpop.f32.mrf.mxu1 }
 0x102   : > { %v871_v48 = vmul.f32 %v1467_v47, %v827_v43 }
 0x103   : > { %v856_v49 = vmul.f32 %v1467_v47, %v789_v45 }
 0x104   : > { %v907_v51 = vadd.f32 %v1472_v50, %v871_v48 }
 0x105   : > { %v892_v52 = vadd.f32 %v1472_v50, %v856_v49 }
 0x106   : > { %v939_v53 = vmax.f32 %v907_v51, 0.0 }
 0x107   : > { %v924_v54 = vmax.f32 %v892_v52, 0.0  ;;  %v586_v56 = vpop.f32.mrf.mxu2 }
 0x108   : > { %971 = vst [vmem:[%s1480_s16 + $0xd0] sm:$0xff] %v939_v53  ;;  %v829_v57 = vadd.f32 %v828_v42, %v586_v56  ;;  %v549_v58 = vpop.f32.mrf.mxu0  ;;  %v838_v45 = vpop.f32.mrf.mxu3 }
 0x109   : > { %956 = vst [vmem:[%s1480_s16 + $0x58] sm:$0xff] %v924_v54  ;;  %v792_v60 = vadd.f32 %v791_v34, %v549_v58  ;;  %v796_v61 = vpop.f32.mrf.mxu1 }
 0x10a   : > { %v872_v62 = vmul.f32 %v1467_v47, %v829_v57 }
 0x10b   : > { %v857_v0 = vmul.f32 %v1467_v47, %v792_v60 }
 0x10c   : > { %v908_v1 = vadd.f32 %v1472_v50, %v872_v62 }
 0x10d   : > { %v893_v2 = vadd.f32 %v1472_v50, %v857_v0 }
 0x10e   : > { %v940_v3 = vmax.f32 %v908_v1, 0.0 }
 0x10f   : > { %v925_v4 = vmax.f32 %v893_v2, 0.0  ;;  %v589_v5 = vpop.f32.mrf.mxu2 }
 0x110   : > { %972 = vst [vmem:[%s1480_s16 + $0xd8] sm:$0xff] %v940_v3  ;;  %v832_v6 = vadd.f32 %v831_v59, %v589_v5  ;;  %v551_v7 = vpop.f32.mrf.mxu0 }
 0x111   : > { %957 = vst [vmem:[%s1480_s16 + $0x60] sm:$0xff] %v925_v4  ;;  %v794_v8 = vadd.f32 %v793_v46, %v551_v7  ;;  %v798_v9 = vpop.f32.mrf.mxu1 }
 0x112   : > { %v873_v10 = vmul.f32 %v1467_v47, %v832_v6 }
 0x113   : > { %v858_v12 = vmul.f32 %v1467_v47, %v794_v8 }
 0x114   : > { %v909_v13 = vadd.f32 %v1472_v50, %v873_v10 }
 0x115   : > { %v894_v14 = vadd.f32 %v1472_v50, %v858_v12 }
 0x116   : > { %v941_v15 = vmax.f32 %v909_v13, 0.0 }
 0x117   : > { %v926_v16 = vmax.f32 %v894_v14, 0.0  ;;  %v591_v17 = vpop.f32.mrf.mxu2 }
 0x118   : > { %973 = vst [vmem:[%s1480_s16 + $0xe0] sm:$0xff] %v941_v15  ;;  %v834_v18 = vadd.f32 %v833_v11, %v591_v17  ;;  %v554_v19 = vpop.f32.mrf.mxu0 }
 0x119   : > { %958 = vst [vmem:[%s1480_s16 + $0x68] sm:$0xff] %v926_v16  ;;  %v797_v20 = vadd.f32 %v796_v61, %v554_v19  ;;  %v801_v21 = vpop.f32.mrf.mxu1 }
 0x11a   : > { %v874_v22 = vmul.f32 %v1467_v47, %v834_v18  ;;  %v802_v23 = vadd.f32 %v801_v21, %v1482_v55 }
 0x11b   : > { %v859_v24 = vmul.f32 %v1467_v47, %v797_v20 }
 0x11c   : > { %v910_v25 = vadd.f32 %v1472_v50, %v874_v22  ;;  %v861_v26 = vmul.f32 %v1467_v47, %v802_v23 }
 0x11d   : > { %v895_v28 = vadd.f32 %v1472_v50, %v859_v24 }
 0x11e   : > { %v942_v29 = vmax.f32 %v910_v25, 0.0  ;;  %v897_v30 = vadd.f32 %v1472_v50, %v861_v26 }
 0x11f   : > { %v927_v31 = vmax.f32 %v895_v28, 0.0  ;;  %v594_v32 = vpop.f32.mrf.mxu2 }
 0x120   : > { %974 = vst [vmem:[%s1480_s16 + $0xe8] sm:$0xff] %v942_v29  ;;  %v929_v33 = vmax.f32 %v897_v30, 0.0  ;;  %v837_v34 = vadd.f32 %v836_v27, %v594_v32  ;;  %v556_v35 = vpop.f32.mrf.mxu0 }
 0x121   : > { %959 = vst [vmem:[%s1480_s16 + $0x70] sm:$0xff] %v927_v31  ;;  %v799_v55 = vadd.f32 %v798_v9, %v556_v35  ;;  %v803_v36 = vpop.f32.mrf.mxu1 }
 0x122   : > { %961 = vst [vmem:[%s1480_s16 + $0x80] sm:$0xff] %v929_v33  ;;  %v875_v37 = vmul.f32 %v1467_v47, %v837_v34  ;;  %v804_v38 = vadd.f32 %v803_v36, %v1487_v63 }
 0x123   : > { %v860_v39 = vmul.f32 %v1467_v47, %v799_v55 }
 0x124   : > { %v911_v40 = vadd.f32 %v1472_v50, %v875_v37  ;;  %v862_v41 = vmul.f32 %v1467_v47, %v804_v38 }
 0x125   : > { %v896_v42 = vadd.f32 %v1472_v50, %v860_v39 }
 0x126   : > { %v943_v43 = vmax.f32 %v911_v40, 0.0  ;;  %v898_v44 = vadd.f32 %v1472_v50, %v862_v41 }
 0x127   : > { %v928_v46 = vmax.f32 %v896_v42, 0.0  ;;  %v596_v48 = vpop.f32.mrf.mxu2 }
 0x128   : > { %975 = vst [vmem:[%s1480_s16 + $0xf0] sm:$0xff] %v943_v43  ;;  %v930_v49 = vmax.f32 %v898_v44, 0.0  ;;  %v839_v51 = vadd.f32 %v838_v45, %v596_v48 }
 0x129   : > { %960 = vst [vmem:[%s1480_s16 + $0x78] sm:$0xff] %v928_v46 }
 0x12a   : > { %962 = vst [vmem:[%s1480_s16 + $0x88] sm:$0xff] %v930_v49  ;;  %v876_v63 = vmul.f32 %v1467_v47, %v839_v51 }
 0x12c   : > { %v912_v52 = vadd.f32 %v1472_v50, %v876_v63 }
 0x12e   : > { %v944_v53 = vmax.f32 %v912_v52, 0.0 }
 0x130   : > { %976 = vst [vmem:[%s1480_s16 + $0xf8] sm:$0xff] %v944_v53 }
 0x131 PF: > { %s16_s21 = sadd.s32 1, %s1322_s21  }
 0x132   : > { %p13_p4 = scmp.ge.s32.totalorder %s16_s21, 4  }
 0x134   :  { %15 = sbr.rel (!%p13_p4) target bundleno = 1 (0x1), region = 77 }

</bundles_post_ra>
